<compile_context>
chip_gen: v6e
topology: v6e:2x2x1
jax: 0.10.0
libtpu: 0.0.40
codegen_flags: <defaults>
</compile_context>

<pallas_src>
import jax
import jax.numpy as jnp
from jax.experimental import pallas as pl
from jax.experimental.pallas import tpu as pltpu

IN_FEATURES = 2
OUT_FEATURES = 1
LANES = 128                       # results per output-slab row
ROW_ELEMS = IN_FEATURES * LANES   # 256 interleaved f32 per input-slab row
MAX_TILE_ROWS = 4096              # 4 MiB in + 2 MiB out per block


def _round_up(v: int, m: int) -> int:
    return ((v + m - 1) // m) * m


def _linear_ref(x, weight, bias):
    """Exact f32 elementwise Linear(2,1) (used for fast path / tail / checks)."""
    return x[:, 0:1] * weight[0, 0] + x[:, 1:2] * weight[1, 0] + bias[None, :]


def _mle_kernel(bias_ref, x_ref, d_ref, o_ref):
    # bias_ref: SMEM f32[1]        (scalar prefetch)
    # x_ref:    VMEM f32[T, 256]   interleaved: lane 2k = x[row,0], 2k+1 = x[row,1]
    # d_ref:    VMEM f32[256,128]  selection matrix with weights folded in
    # o_ref:    VMEM f32[T, 128]   lane-dense results
    o_ref[...] = (
        jnp.dot(
            x_ref[...],
            d_ref[...],
            preferred_element_type=jnp.float32,
            precision=jax.lax.Precision.HIGHEST,
        )
        + bias_ref[0]
    ).astype(o_ref.dtype)


def mle_forward(x, weight, bias, *, min_pallas_rows: int = 65536):
    """Forward of the PyTorch `MLE` module.

    x:      f32[N, 2]
    weight: f32[2, 1]  (== torch_linear.weight.T — note the transposed layout)
    bias:   f32[1]
    returns f32[N, 1]
    """
    assert x.ndim == 2 and x.shape[1] == IN_FEATURES, x.shape
    assert weight.shape == (IN_FEATURES, OUT_FEATURES), weight.shape
    assert bias.shape == (OUT_FEATURES,), bias.shape

    n = x.shape[0]
    x = x.astype(jnp.float32)
    weight = weight.astype(jnp.float32)
    bias = bias.astype(jnp.float32)

    # Small-N fast path: kernel launch + layout overhead exceeds the op itself.
    if n < LANES or n < min_pallas_rows:
        return _linear_ref(x, weight, bias)

    n128 = (n // LANES) * LANES      # bulk handled by the Pallas kernel
    r = n128 // LANES                # slab rows (128 results per row)

    # Interleaved input slab: pure reshape of the contiguous [N,2] buffer.
    # slab[t, c] = x[128*t + c // 2, c % 2]
    x_bulk = x if n128 == n else x[:n128]
    x_slab = x_bulk.reshape(r, ROW_ELEMS)

    # (256,128) selection matrix with the weights folded in (128 KiB; in a real
    # module this would be built once at init time).
    eye = jnp.eye(LANES, dtype=jnp.float32)
    d_mat = jnp.stack([weight[0, 0] * eye, weight[1, 0] * eye], axis=1)
    d_mat = d_mat.reshape(ROW_ELEMS, LANES)

    # Tile the slab rows: big blocks to amortize per-step overhead, but always
    # aim for a multi-step grid (pipelining; both v7x TensorCores).
    if r <= 8:
        tile_rows = r
    else:
        tile_rows = min(MAX_TILE_ROWS, _round_up(pl.cdiv(r, 4), 8))
        tile_rows = min(tile_rows, _round_up(r, 8))
    grid = pl.cdiv(r, tile_rows)     # ragged last block handled by Pallas

    out_slab = pl.pallas_call(
        _mle_kernel,
        out_shape=jax.ShapeDtypeStruct((r, LANES), jnp.float32),
        grid_spec=pltpu.PrefetchScalarGridSpec(
            num_scalar_prefetch=1,   # bias -> SMEM scalar
            grid=(grid,),
            in_specs=[
                pl.BlockSpec((tile_rows, ROW_ELEMS), lambda i, b: (i, 0)),
                # constant block index -> fetched once, stays resident in VMEM
                pl.BlockSpec((ROW_ELEMS, LANES), lambda i, b: (0, 0)),
            ],
            out_specs=pl.BlockSpec((tile_rows, LANES), lambda i, b: (i, 0)),
        ),
        compiler_params=pltpu.CompilerParams(
            dimension_semantics=("parallel",),
        ),
        cost_estimate=pl.CostEstimate(
            flops=2 * ROW_ELEMS * n128,
            transcendentals=0,
            bytes_accessed=12 * n128 + ROW_ELEMS * LANES * 4 + 4,
        ),
    )(bias, x_slab, d_mat)

    out_bulk = out_slab.reshape(n128, OUT_FEATURES)   # contiguous -> free view
    if n128 == n:
        return out_bulk
    tail = _linear_ref(x[n128:], weight, bias)        # < 128 rows
    return jnp.concatenate([out_bulk, tail], axis=0)


if __name__ == "__main__":
    key = jax.random.PRNGKey(0)
    kx1, kx2, kw, kb = jax.random.split(key, 4)

    # nn.Linear(2, 1) parameters: PyTorch weight is [1, 2]; we keep W^T = [2, 1].
    bound = 1.0 / jnp.sqrt(jnp.float32(IN_FEATURES))
    weight = jax.random.uniform(
        kw, (IN_FEATURES, OUT_FEATURES), jnp.float32, -bound, bound
    )
    bias = jax.random.uniform(kb, (OUT_FEATURES,), jnp.float32, -bound, bound)

    # (a) Small batch (same scale as the PyTorch module's typical use): fast path.
    x_small = jax.random.normal(kx1, (8, IN_FEATURES), jnp.float32)
    out_small = jax.block_until_ready(mle_forward(x_small, weight, bias))
    ref_small = _linear_ref(x_small, weight, bias)
    assert out_small.shape == (8, OUT_FEATURES)
    assert jnp.allclose(out_small, ref_small, atol=1e-5, rtol=1e-5)

    # (b) Larger batch forced through the Pallas kernel: multi-step grid,
    #     ragged last block, and a <128-row jnp tail.
    n_big = 128 * 40 + 37
    x_big = jax.random.normal(kx2, (n_big, IN_FEATURES), jnp.float32)
    out_big = jax.block_until_ready(
        mle_forward(x_big, weight, bias, min_pallas_rows=0)
    )
    ref_big = _linear_ref(x_big, weight, bias)
    assert out_big.shape == (n_big, OUT_FEATURES)
    assert jnp.allclose(out_big, ref_big, atol=1e-5, rtol=1e-5)

    print("KERNEL_OK")
</pallas_src>

<mosaic_0001>
module attributes {stable_mosaic.version = 11 : i64} {
  func.func @_mle_kernel(%arg0: i32, %arg1: memref<1xf32, #tpu.memory_space<smem>>, %arg2: memref<16x256xf32, #tpu.memory_space<vmem>>, %arg3: memref<256x128xf32, #tpu.memory_space<vmem>>, %arg4: memref<16x128xf32, #tpu.memory_space<vmem>>) attributes {dimension_semantics = [#tpu.dimension_semantics<parallel>], iteration_bounds = array<i64: 3>, scalar_prefetch = 1 : i64, scratch_operands = 0 : i64, tpu.core_type = #tpu.core_type<tc>, window_params = [{transform_indices = @transform_0, window_bounds = array<i64: 16, 256>}, {pipeline_mode = #tpu.pipeline_mode<synchronous>, transform_indices = @transform_1, window_bounds = array<i64: 256, 128>}, {transform_indices = @transform_2, window_bounds = array<i64: 16, 128>}]} {
    %c0 = arith.constant 0 : index
    %c0_0 = arith.constant 0 : index
    %0 = vector.load %arg2[%c0, %c0_0] : memref<16x256xf32, #tpu.memory_space<vmem>>, vector<16x256xf32>
    %c0_1 = arith.constant 0 : index
    %c0_2 = arith.constant 0 : index
    %1 = vector.load %arg3[%c0_1, %c0_2] : memref<256x128xf32, #tpu.memory_space<vmem>>, vector<256x128xf32>
    %cst = arith.constant dense<0.000000e+00> : vector<16x128xf32>
    %2 = tpu.matmul %0, %1, %cst {dimension_numbers = #tpu.dot_dimension_numbers<[1], [0], [0], [1], [0, 0, 1, 1], [], []>, precision = #tpu.contract_precision<fp32>} : vector<16x256xf32>, vector<256x128xf32>, vector<16x128xf32> -> vector<16x128xf32>
    %c0_3 = arith.constant 0 : index
    %3 = memref.load %arg1[%c0_3] : memref<1xf32, #tpu.memory_space<smem>>
    %4 = vector.broadcast %3 : f32 to vector<16x128xf32>
    %5 = arith.addf %2, %4 : vector<16x128xf32>
    %c0_4 = arith.constant 0 : index
    %c0_5 = arith.constant 0 : index
    %6 = vector.load %arg4[%c0_4, %c0_5] : memref<16x128xf32, #tpu.memory_space<vmem>>, vector<16x128xf32>
    tpu.vector_store %arg4[%c0_4, %c0_5], %5 {strides = array<i32>} : memref<16x128xf32, #tpu.memory_space<vmem>>, vector<16x128xf32>,
    return
  }
  func.func @transform_0(%arg0: i32, %arg1: memref<1xf32, #tpu.memory_space<smem>>) -> (i32, i32) {
    %c0_i32 = arith.constant 0 : i32
    %c0_i32_0 = arith.constant 0 : i32
    return %arg0, %c0_i32 : i32, i32
  }
  func.func @transform_1(%arg0: i32, %arg1: memref<1xf32, #tpu.memory_space<smem>>) -> (i32, i32) {
    %c0_i32 = arith.constant 0 : i32
    %c0_i32_0 = arith.constant 0 : i32
    %c0_i32_1 = arith.constant 0 : i32
    return %c0_i32, %c0_i32_0 : i32, i32
  }
  func.func @transform_2(%arg0: i32, %arg1: memref<1xf32, #tpu.memory_space<smem>>) -> (i32, i32) {
    %c0_i32 = arith.constant 0 : i32
    %c0_i32_0 = arith.constant 0 : i32
    return %arg0, %c0_i32 : i32, i32
  }
}

</mosaic_0001>

<bundles_post_ra>
// kernel: tpu_custom_call.1
= control target key start
LH: loop header
LB: loop body
LE: loop exit
PB: predicated region body
PF: predicated region fallthrough
CT: control target
= control target key end

     0   :  { %s2556_s0 = inlined_call_operand.<no memory space> [shape: f32[1], index: 0, kind: input, shape index: {}]   ;;  %s2557_s1 = inlined_call_operand.hbm [shape: f32[40,256], index: 1, kind: input, shape index: {}]   ;;  %s2558_s2 = inlined_call_operand.hbm [shape: f32[256,128], index: 2, kind: input, shape index: {}]   ;;  %s2559_s3 = inlined_call_operand.hbm [shape: f32[40,128], index: 3, kind: output, shape index: {}]  }
   0x1   :  { %8 = sst [smem:[#allocation3]] %s2556_s0 }
   0x2   :  { %9 = vsyncpa [#allocation5], 0 }
   0x3   :  { %11 = vsyncpa [#allocation5 + $0x1], 0 }
   0x4   :  { %12 = vsyncpa [#allocation8], 0 }
   0x5   :  { %13 = vsyncpa [#allocation6], 0 }
   0x6   :  { %15 = vsyncpa [#allocation6 + $0x1], 0  ;;  %s1727_s14 = smov 0   ;;  %s1729_s15 = smov 0  }
   0x7   :  { %s1731_s16 = smov 0   ;;  %s1733_s17 = smov 0  }
   0x8 LB: > { %s1748_s0 = sadd.s32 4294967295, %s1693_s17   ;;  %s1259_s18 = sadd.s32 4294967294, %s1693_s17   ;;  %s1693_s17 = sphi %s1733_s17, %s2745_s17   ;;  %s1689_s16 = sphi %s1731_s16, %s2744_s16   ;;  %s1685_s15 = sphi %s1729_s15, %s2743_s15   ;;  %s1681_s14 = sphi %s1727_s14, %s2742_s14  }
   0x9   : > { %s1752_s19 = sadd.s32 1, %s1693_s17   ;;  %s28_s20 = sadd.s32 1, %s1689_s16 }
   0xa   : > { %s25_s21 = ssub.s32 %s1693_s17, %s1752_s19  ;;  %p35_p0 = scmp.ne.s32.totalorder %s1689_s16, %s1685_s15 }
   0xb   : > { %p26_p1 = scmp.eq.s32.totalorder %s25_s21, 0  ;;  %p36_p2 = scmp.eq.s32.totalorder %s1693_s17, 0 }
   0xc   : > { %p41_p3 = scmp.ne.s32.totalorder %s1685_s15, %s1681_s14  ;;  %p42_p4 = scmp.eq.s32.totalorder %s1748_s0, 0 }
   0xd   : > { %s1764_s22 = scalar_select %p26_p1, %s1689_s16, %s28_s20  }
   0xe   : > { %p1766_p5 = por %p36_p2, %p35_p0  ;;  %p1772_p6 = por %p42_p4, %p41_p3 }
   0xf   : > { %p86_p7 = scmp.eq.s32.totalorder %s1748_s0, 2  ;;  %p92_p8 = scmp.eq.s32.totalorder %s1259_s18, 2 }
  0x10   : > { %s2634_s24 = scalar_select %p1772_p6, 1, 0 }
  0x11   : > { %p1260_p9 = scmp.ge.s32.totalorder %s1693_s17, 1  ;;  %p99_p10 = scmp.lt.s32.totalorder %s1693_s17, 4 }
  0x12   : > { %p1779_p11 = por %p86_p7, %p35_p0  ;;  %p1783_p12 = por %p92_p8, %p41_p3 }
  0x13   : > { %p1787_p13 = pnand %p1260_p9, %p99_p10  ;;  %s1695_s28 = smov [#allocation7]  }
  0x14   : > { %s2635_s25 = scalar_select %p1779_p11, 1, 0 }
  0x15   : > { %s2636_s26 = scalar_select %p1783_p12, 1, 0 }
  0x16   : > { %p1523_p1 = pneg %p1787_p13  ;;  %s111_s29 = sshll.u32 %s1695_s28, 4  ;;  %s112_s29 = int_to_ptr.vmem [resolvable:$true] %s111_s29 }
  0x17   : > { %s1584_s30 = scalar_lea.vmem %s112_s29, 4096  ;;  %p1592_p8 = scmp.lt.s32.totalorder %s112_s29, %s112_s29 }
  0x18   : > { %p1524_p2 = pnand %p1523_p1, %p42_p4  ;;  %p1585_p7 = scmp.ne.s32.totalorder %s112_s29, %s1584_s30 }
  0x19   : > { %p1593_p6 = scmp.lt.s32.totalorder %s1584_s30, %s1584_s30 }
  0x1a   : > { %p1575_p0 = pneg %p1524_p2 }
  0x1b   : > { %p1594_p12 = por %p1593_p6, %p1592_p8 }
  0x1c   : > { %p1587_p11 = pnand %p1585_p7, %p1575_p0 }
  0x1e   : > { %p1588_p3 = pneg %p1587_p11 }
  0x20   : > { %p1595_p9 = pnand %p1594_p12, %p1588_p3 }
  0x22   : > { %1598 = shalt.err (!%p1595_p9)
}
  0x23   : > { %s1696_s4 = smov 128   ;;  %s1697_s5 = smov 8  }
  0x24   : > { %1526 = dma.hbm_to_vmem [thread:$0]  (!%p1524_p2), %s2558_s2, 4096, %s112_s29, [#allocation8], %s1696_s4, %s1696_s4, %s1697_s5  }
  0x25   : > { %p1262_p10 = scmp.ge.s32.totalorder %s1693_s17, 3 }
  0x27   : > { %121 = sbr.rel (%p1262_p10) target bundleno = 76 (0x4c), region = 20 }
  0x2c   : > { %124 = sbr.rel (!%p1766_p5) target bundleno = 76 (0x4c), region = 24  ;;  %s125_s8 = sand.u32 (%p1766_p5), 1, %s1689_s16  }
  0x2d   : > { %s1264_s9 = sshll.u32 (%p1766_p5), %s1693_s17, 1  ;;  %s1263_s10 = sshll.u32 (%p1766_p5), %s125_s8, 5 }
  0x2e   : > { %s131_s11 = ssub.s32 (%p1766_p5), 5, %s1264_s9  ;;  %s1806_s18 = scalar_lea.sflag (%p1766_p5), [#allocation5], %s125_s8 }
  0x2f   : > { %p132_p6 = scmp.lt.s32.totalorder (%p1766_p5), %s131_s11, 2  ;;  %s129_s20 = scalar_lea.vmem (%p1766_p5), [#allocation4], %s1263_s10 }
  0x31   : > { %s2747_s11 = smov (!%p132_p6, %s131_s11), 2 }
  0x32   : > { %s1803_s12 = sshll.u32 %s2747_s11, 8 }
  0x33   : > { %s137_s13 = ssub.s32 512, %s1803_s12 }
  0x34   : > { %138 = vsyncadd %s1806_s18, %s137_s13  ;;  %p1267_p5 = scmp.ne.s32.totalorder %s1803_s12, 0  ;;  %s1287_s21 = sshll.u32 %s1693_s17, 9 }
  0x35   : > { %s1814_s29 = scalar_lea.hbm %s2557_s1, %s1287_s21  ;;  %s144_s30 = sshll.u32 %s129_s20, 4  ;;  %s1816_s30 = int_to_ptr.vmem [resolvable:$true] %s144_s30 }
  0x36   : > { %s1599_s4 = scalar_lea.hbm %s1814_s29, %s1803_s12  ;;  %s1603_s7 = scalar_lea.hbm %s2557_s1, 1280 }
  0x37   : > { %p1600_p11 = scmp.ne.s32.totalorder %s1814_s29, %s1599_s4  ;;  %p1604_p2 = scmp.lt.s32.totalorder %s1814_s29, %s2557_s1 }
  0x38   : > { %p1605_p0 = scmp.lt.s32.totalorder %s1603_s7, %s1599_s4 }
  0x39   : > { %p1601_p12 = pnand %p1600_p11, %p1267_p5 }
  0x3a   : > { %p1606_p7 = por %p1605_p0, %p1604_p2 }
  0x3b   : > { %p1602_p1 = pneg %p1601_p12 }
  0x3d   : > { %p1607_p3 = pnand %p1606_p7, %p1602_p1 }
  0x3f   : > { %1610 = shalt.err (!%p1607_p3)
}
  0x40   : > { %s1611_s10 = scalar_lea.vmem %s1816_s30, %s1803_s12  ;;  %s1698_s11 = smov [#allocation4]  }
  0x41   : > { %p1612_p8 = scmp.ne.s32.totalorder %s1816_s30, %s1611_s10  ;;  %s1615_s13 = sshll.u32 %s1698_s11, 4  ;;  %s1616_s13 = int_to_ptr.vmem [resolvable:$false] %s1615_s13 }
  0x42   : > { %s1617_s20 = scalar_lea.vmem %s1616_s13, 1024  ;;  %p1618_p6 = scmp.lt.s32.totalorder %s1816_s30, %s1616_s13 }
  0x43   : > { %p1613_p9 = pnand %p1612_p8, %p1267_p5  ;;  %p1619_p11 = scmp.lt.s32.totalorder %s1617_s20, %s1611_s10 }
  0x45   : > { %p1614_p10 = pneg %p1613_p9  ;;  %p1620_p12 = por %p1619_p11, %p1618_p6 }
  0x47   : > { %p1621_p2 = pnand %p1620_p12, %p1614_p10 }
  0x49   : > { %1624 = shalt.err (!%p1621_p2)
}
  0x4a   : > { %s1699_s21 = smov 256   ;;  %s1700_s23 = smov 16  }
  0x4b   : > { %150 = dma.hbm_to_vmem [thread:$0]  (%p1267_p5), %s1814_s29, %s1803_s12, %s1816_s30, %s1806_s18, %s1699_s21, %s1699_s21, %s1700_s23  }
  0x4c PF: > { %156 = sbr.rel (%p1787_p13) target bundleno = 440 (0x1b8), region = 28 }
  0x51   : > { %s1845_s28 = sand.u32 1, %s1685_s15   ;;  %p2638_p1 = scmp.ne.s32.totalorder %s2634_s24, 0 }
  0x52   : > { %s1273_s4 = sshll.u32 %s1845_s28, 5  ;;  %s159_s5 = scalar_lea.sflag [#allocation5], %s1845_s28 }
  0x53   : > { %s1849_s6 = scalar_lea.vmem [#allocation4], %s1273_s4 }
  0x54   : > { %1668 = dma.done.wait (%p2638_p1), %s159_s5, 512  }
  0x55   : > { %1670 = vsyncadd (%p2638_p1), %s159_s5, 4294966784 }
  0x56   : > { %1672 = dma.done.wait (%p42_p4), [#allocation8], 4096  }
  0x57   : > { %1674 = vsyncadd (%p42_p4), [#allocation8], 4294963200  ;;  %v233_v0 = vld [vmem:[#allocation7 + $0xf8] sm:$0xff]  ;;  %v232_v2 = vld [vmem:[#allocation7 + $0xf0] sm:$0xff]  ;;  %s234_s24 = sld [smem:[#allocation3]]  ;;  %s1275_s27 = sshll.u32 %s1845_s28, 4 }
  0x58   : > { %v217_v1 = vld [vmem:[#allocation7 + $0x78] sm:$0xff]  ;;  %v1859_v3 = vand.u32 4294901760, %v233_v0  ;;  %v1863_v5 = vand.u32 4294901760, %v232_v2  ;;  %v216_v6 = vld [vmem:[#allocation7 + $0x70] sm:$0xff]  ;;  %v231_v7 = vld [vmem:[#allocation7 + $0xe8] sm:$0xff]  ;;  %s186_s12 = scalar_lea.vmem [#allocation9], %s1275_s27 }
  0x59   : > { %v1861_v4 = vand.u32 4294901760, %v217_v1  ;;  %v215_v8 = vld [vmem:[#allocation7 + $0x68] sm:$0xff]  ;;  %v1865_v9 = vand.u32 4294901760, %v216_v6  ;;  %v1867_v10 = vand.u32 4294901760, %v231_v7  ;;  %v230_v12 = vld [vmem:[#allocation7 + $0xe0] sm:$0xff]  ;;  %v229_v14 = vld [vmem:[#allocation7 + $0xd8] sm:$0xff] }
  0x5a   : > { %v1869_v11 = vand.u32 4294901760, %v215_v8  ;;  %v214_v13 = vld [vmem:[#allocation7 + $0x60] sm:$0xff]  ;;  %1289 = vmatprep.subr.mxu0 %v1859_v3  ;;  %v1872_v15 = vand.u32 4294901760, %v230_v12  ;;  %v1876_v17 = vand.u32 4294901760, %v229_v14  ;;  %v1879_v18 = vsub.f32 %v233_v0, %v1859_v3  ;;  %v1881_v19 = vld [vmem:[#allocation7 + $0x58] sm:$0xff]  ;;  %v1883_v20 = vld [vmem:[#allocation7 + $0xd0] sm:$0xff] }
  0x5b   : > { %v1874_v16 = vand.u32 4294901760, %v214_v13  ;;  %v1885_v21 = vld [vmem:[#allocation7 + $0x50] sm:$0xff]  ;;  %1290 = vmatpush3.msra.mxu0 %v1861_v4  ;;  %v1889_v22 = vand.u32 4294901760, %v1881_v19  ;;  %v1892_v23 = vsub.f32 %v217_v1, %v1861_v4  ;;  %v1895_v24 = vand.u32 4294901760, %v1883_v20  ;;  %v1900_v26 = vld [vmem:[#allocation7 + $0xc8] sm:$0xff]  ;;  %v1904_v28 = vld [vmem:[#allocation7 + $0xc0] sm:$0xff] }
  0x5c   : > { %v1898_v25 = vsub.f32 %v232_v2, %v1863_v5  ;;  %v1902_v27 = vld [vmem:[#allocation7 + $0x48] sm:$0xff]  ;;  %1291 = vmatprep.subr.mxu0 %v1863_v5  ;;  %v2574_v29 = vand.u32 4294901760, %v1879_v18  ;;  %v1909_v30 = vand.u32 4294901760, %v1885_v21  ;;  %v1912_v31 = vsub.f32 %v216_v6, %v1865_v9  ;;  %v1926_v37 = vld [vmem:[#allocation7 + $0x40] sm:$0xff]  ;;  %v1950_v46 = vld [vmem:[#allocation7 + $0xb8] sm:$0xff]  ;;  %s1157_s18 = scalar_lea.sflag [#allocation6], %s1845_s28 }
  0x5d   : > { %2639 = vst [vmem:[#allocation13_spill] sm:$0xff] %v1895_v24  ;;  %v1915_v32 = vand.u32 4294901760, %v1900_v26  ;;  %1292 = vmatpush3.msra.mxu0 %v1865_v9  ;;  %v2572_v33 = vand.u32 4294901760, %v1892_v23  ;;  %v1921_v35 = vsub.f32 %v231_v7, %v1867_v10  ;;  %v1924_v36 = vand.u32 4294901760, %v1902_v27  ;;  %v1960_v51 = vld [vmem:[#allocation7 + $0x38] sm:$0xff]  ;;  %v1967_v56 = vld [vmem:[#allocation7 + $0xb0] sm:$0xff] }
  0x5e   : > { %2640 = vst [vmem:[#allocation14_spill] sm:$0xff] %v1909_v30  ;;  %v2571_v34 = vand.u32 4294901760, %v1898_v25  ;;  %1293 = vmatprep.subr.mxu0 %v1867_v10  ;;  %v479_v38 = vsub.f32 %v1879_v18, %v2574_v29  ;;  %v2569_v39 = vand.u32 4294901760, %v1912_v31  ;;  %v1934_v40 = vsub.f32 %v215_v8, %v1869_v11  ;;  %v1979_v61 = vld [vmem:[#allocation7 + $0x30] sm:$0xff]  ;;  %v1991_v2 = vld [vmem:[#allocation7 + $0xa8] sm:$0xff]  ;;  %p2740_p4 = scmp.ne.s32.totalorder %s2635_s25, 0 }
  0x5f   : > { %2641 = vst [vmem:[#allocation15_spill] sm:$0xff] %v1915_v32  ;;  %2642 = vst [vmem:[#allocation16_spill] sm:$0xff] %v1924_v36  ;;  %v1937_v41 = vand.u32 4294901760, %v1904_v28  ;;  %1294 = vmatpush3.msra.mxu0 %v1869_v11  ;;  %v367_v42 = vsub.f32 %v1892_v23, %v2572_v33  ;;  %v2567_v44 = vand.u32 4294901760, %v1921_v35  ;;  %v1948_v45 = vsub.f32 %v230_v12, %v1872_v15  ;;  %s1277_s29 = sshll.u32 (%p2740_p4), %s1748_s0, 1 }
  0x60   : > { %v486_v43 = vsub.f32 %v1898_v25, %v2571_v34  ;;  %1295 = vmatprep.subr.mxu0 %v1872_v15  ;;  %v480_v47 = vand.u32 4294901760, %v479_v38  ;;  %v374_v48 = vsub.f32 %v1912_v31, %v2569_v39  ;;  %v2566_v49 = vand.u32 4294901760, %v1934_v40  ;;  %v2082_v39 = vld [vmem:[#allocation7 + $0x90] sm:$0xff]  ;;  %s1165_s30 = ssub.s32 (%p2740_p4), 5, %s1277_s29 }
  0x61   : > { %2643 = vst [vmem:[#allocation17_spill] sm:$0xff] %v1937_v41  ;;  %v1958_v50 = vand.u32 4294901760, %v1926_v37  ;;  %1296 = vmatpush3.msra.mxu0 %v1874_v16  ;;  %v368_v52 = vand.u32 4294901760, %v367_v42  ;;  %v493_v54 = vsub.f32 %v1921_v35, %v2567_v44  ;;  %v2564_v55 = vand.u32 4294901760, %v1948_v45  ;;  %v2092_v34 = vld [vmem:[#allocation7 + $0x10] sm:$0xff]  ;;  %p1166_p13 = scmp.lt.s32.totalorder (%p2740_p4), %s1165_s30, 2 }
  0x62   : > { %v487_v53 = vand.u32 4294901760, %v486_v43  ;;  %1297 = vmatprep.subr.mxu0 %v1876_v17  ;;  %1327 = vmatprep.subr.mxu1 %v480_v47  ;;  %v375_v57 = vand.u32 4294901760, %v374_v48  ;;  %v381_v58 = vsub.f32 %v1934_v40, %v2566_v49  ;;  %v1974_v59 = vsub.f32 %v214_v13, %v1874_v16  ;;  %v2002_v13 = vld [vmem:[#allocation7 + $0x28] sm:$0xff]  ;;  %v2069_v49 = vld [vmem:[#allocation7 + $0x18] sm:$0xff] }
  0x63   : > { %2644 = vst [vmem:[#allocation18_spill] sm:$0xff] %v1958_v50  ;;  %v1977_v60 = vand.u32 4294901760, %v1950_v46  ;;  %1298 = vmatpush3.msra.mxu0 %v1889_v22  ;;  %1328 = vmatpush3.msra.mxu1 %v368_v52  ;;  %v494_v62 = vand.u32 4294901760, %v493_v54  ;;  %v500_v63 = vsub.f32 %v1948_v45, %v2564_v55  ;;  %v1986_v0 = vsub.f32 %v229_v14, %v1876_v17 }
  0x64   : > { %v1989_v1 = vand.u32 4294901760, %v1960_v51  ;;  %1299 = vmatprep.subr.mxu0 %v1895_v24  ;;  %1329 = vmatprep.subr.mxu1 %v487_v53  ;;  %v382_v6 = vand.u32 4294901760, %v381_v58  ;;  %v2562_v7 = vand.u32 4294901760, %v1974_v59  ;;  %v1997_v8 = vsub.f32 %v1881_v19, %v1889_v22 }
  0x65   : > { %2645 = vst [vmem:[#allocation19_spill] sm:$0xff] %v1977_v60  ;;  %v2000_v12 = vand.u32 4294901760, %v1967_v56  ;;  %1300 = vmatpush3.msra.mxu0 %v1909_v30  ;;  %1330 = vmatpush3.msra.mxu1 %v375_v57  ;;  %v501_v14 = vand.u32 4294901760, %v500_v63  ;;  %v2561_v38 = vand.u32 4294901760, %v1986_v0  ;;  %v2008_v42 = vsub.f32 %v1883_v20, %v1895_v24  ;;  %v2025_v20 = vld [vmem:[#allocation7 + $0xa0] sm:$0xff] }
  0x66   : > { %2646 = vst [vmem:[#allocation20_spill] sm:$0xff] %v1989_v1  ;;  %v2011_v43 = vand.u32 4294901760, %v1979_v61  ;;  %1301 = vmatprep.subr.mxu0 %v1915_v32  ;;  %1331 = vmatprep.subr.mxu1 %v494_v62  ;;  %v388_v19 = vsub.f32 %v1974_v59, %v2562_v7  ;;  %v2563_v47 = vand.u32 4294901760, %v1997_v8  ;;  %v2020_v48 = vsub.f32 %v1885_v21, %v1909_v30 }
  0x67   : > { %2647 = vst [vmem:[#allocation21_spill] sm:$0xff] %v2000_v12  ;;  %v2023_v52 = vand.u32 4294901760, %v1991_v2  ;;  %1302 = vmatpush3.msra.mxu0 %v1924_v36  ;;  %1332 = vmatpush3.msra.mxu1 %v382_v6  ;;  %v507_v53 = vsub.f32 %v1986_v0, %v2561_v38  ;;  %v2565_v54 = vand.u32 4294901760, %v2008_v42  ;;  %v2034_v57 = vsub.f32 %v1900_v26, %v1915_v32  ;;  %v2048_v38 = vld [vmem:[#allocation7 + $0x20] sm:$0xff] }
  0x68   : > { %2648 = vst [vmem:[#allocation22_spill] sm:$0xff] %v2011_v43  ;;  %v2037_v21 = vand.u32 4294901760, %v2002_v13  ;;  %1303 = vmatprep.subr.mxu0 %v1937_v41  ;;  %1333 = vmatprep.subr.mxu1 %v501_v14  ;;  %v389_v58 = vand.u32 4294901760, %v388_v19  ;;  %v395_v62 = vsub.f32 %v1997_v8, %v2563_v47  ;;  %v2568_v63 = vand.u32 4294901760, %v2020_v48  ;;  %v2058_v47 = vld [vmem:[#allocation7 + $0x98] sm:$0xff] }
  0x69   : > { %2649 = vst [vmem:[#allocation23_spill] sm:$0xff] %v2023_v52  ;;  %v2046_v6 = vsub.f32 %v1902_v27, %v1924_v36  ;;  %1304 = vmatpush3.msra.mxu0 %v1958_v50  ;;  %v508_v26 = vand.u32 4294901760, %v507_v53  ;;  %v514_v14 = vsub.f32 %v2008_v42, %v2565_v54  ;;  %v2570_v19 = vand.u32 4294901760, %v2034_v57  ;;  %v199_v36 = vld [vmem:[%s1849_s6 + $0x8] sm:$0xff] }
  0x6a   : > { %2650 = vst [vmem:[#allocation24_spill] sm:$0xff] %v2037_v21  ;;  %v2056_v7 = vand.u32 4294901760, %v2025_v20  ;;  %1334 = vmatpush3.msra.mxu1 %v389_v58  ;;  %1305 = vmatprep.subr.mxu0 %v1977_v60  ;;  %v396_v27 = vand.u32 4294901760, %v395_v62  ;;  %v402_v55 = vsub.f32 %v2020_v48, %v2568_v63  ;;  %v2067_v54 = vsub.f32 %v1904_v28, %v1937_v41 }
  0x6b   : > { %v2573_v53 = vand.u32 4294901760, %v2046_v6  ;;  %1335 = vmatprep.subr.mxu1 %v508_v26  ;;  %1306 = vmatpush3.msra.mxu0 %v1989_v1  ;;  %v515_v44 = vand.u32 4294901760, %v514_v14  ;;  %v521_v58 = vsub.f32 %v2034_v57, %v2570_v19  ;;  %v2076_v62 = vand.u32 4294901760, %v2048_v38 }
  0x6c   : > { %2651 = vst [vmem:[#allocation25_spill] sm:$0xff] %v2056_v7  ;;  %v2080_v63 = vsub.f32 %v1926_v37, %v1958_v50  ;;  %1336 = vmatpush3.msra.mxu1 %v396_v27  ;;  %1307 = vmatprep.subr.mxu0 %v2000_v12  ;;  %v403_v28 = vand.u32 4294901760, %v402_v55  ;;  %v2577_v14 = vand.u32 4294901760, %v2067_v54  ;;  %v2090_v19 = vand.u32 4294901760, %v2058_v47 }
  0x6d   : > { %2652 = vst [vmem:[#allocation26_spill] sm:$0xff] %v2076_v62  ;;  %v409_v26 = vsub.f32 %v2046_v6, %v2573_v53  ;;  %1337 = vmatprep.subr.mxu1 %v515_v44  ;;  %1308 = vmatpush3.msra.mxu0 %v2011_v43  ;;  %v522_v37 = vand.u32 4294901760, %v521_v58  ;;  %v2098_v55 = vsub.f32 %v1950_v46, %v1977_v60  ;;  %v2101_v33 = vand.u32 4294901760, %v2069_v49  ;;  %v2103_v53 = vld [vmem:[#allocation7 + $0x88] sm:$0xff] }
  0x6e   : > { %2653 = vst [vmem:[#allocation27_spill] sm:$0xff] %v2090_v19  ;;  %v2580_v27 = vand.u32 4294901760, %v2080_v63  ;;  %1338 = vmatpush3.msra.mxu1 %v403_v28  ;;  %1309 = vmatprep.subr.mxu0 %v2023_v52  ;;  %v528_v44 = vsub.f32 %v2067_v54, %v2577_v14  ;;  %v2111_v58 = vsub.f32 %v1960_v51, %v1989_v1  ;;  %v2114_v46 = vand.u32 4294901760, %v2082_v39  ;;  %v2128_v51 = vld [vmem:[#allocation7 + $0x8] sm:$0xff] }
  0x6f   : > { %2654 = vst [vmem:[#allocation28_spill] sm:$0xff] %v2101_v33  ;;  %v410_v29 = vand.u32 4294901760, %v409_v26  ;;  %1339 = vmatprep.subr.mxu1 %v522_v37  ;;  %1310 = vmatpush3.msra.mxu0 %v2037_v21  ;;  %v2123_v60 = vsub.f32 %v1967_v56, %v2000_v12  ;;  %v2126_v14 = vand.u32 4294901760, %v2092_v34  ;;  %v2137_v26 = vand.u32 4294901760, %v2103_v53  ;;  %v2139_v56 = vld [vmem:[#allocation7 + $0x80] sm:$0xff] }
  0x70   : > { %2655 = vst [vmem:[#allocation29_spill] sm:$0xff] %v2114_v46  ;;  %v416_v28 = vsub.f32 %v2080_v63, %v2580_v27  ;;  %1311 = vmatprep.subr.mxu0 %v2056_v7  ;;  %v529_v37 = vand.u32 4294901760, %v528_v44  ;;  %v2134_v27 = vsub.f32 %v1979_v61, %v2011_v43  ;;  %v2658_v50 = vand.u32 4294901760, %v2098_v55  ;;  %v2162_v44 = vld [vmem:[#allocation7] sm:$0xff] }
  0x71   : > { %2656 = vst [vmem:[#allocation30_spill] sm:$0xff] %v2126_v14  ;;  %1340 = vmatpush3.msra.mxu1 %v410_v29  ;;  %2657 = vst [vmem:[#allocation31_spill] sm:$0xff] %v2137_v26  ;;  %1312 = vmatpush3.msra.mxu0 %v2076_v62  ;;  %v2148_v1 = vsub.f32 %v1991_v2, %v2023_v52  ;;  %v2660_v61 = vand.u32 4294901760, %v2111_v58  ;;  %v2156_v41 = vand.u32 4294901760, %v2128_v51  ;;  %v2170_v52 = vand.u32 4294901760, %v2139_v56 }
  0x72   : > { %v417_v12 = vand.u32 4294901760, %v416_v28  ;;  %v535_v29 = vsub.f32 %v2098_v55, %v2658_v50  ;;  %1341 = vmatprep.subr.mxu1 %v529_v37  ;;  %1313 = vmatprep.subr.mxu0 %v2090_v19  ;;  %v2160_v50 = vsub.f32 %v2002_v13, %v2037_v21  ;;  %v2662_v37 = vand.u32 4294901760, %v2123_v60 }
  0x73   : > { %2659 = vst [vmem:[#allocation32_spill] sm:$0xff] %v2148_v1  ;;  %v423_v43 = vsub.f32 %v2111_v58, %v2660_v61  ;;  %1314 = vmatpush3.msra.mxu0 %v2101_v33  ;;  %v2663_v13 = vand.u32 4294901760, %v2134_v27  ;;  %v2180_v21 = vsub.f32 %v2025_v20, %v2056_v7  ;;  %v2664_v30 = vand.u32 4294901760, %v2148_v1 }
  0x74   : > { %2661 = vst [vmem:[#allocation33_spill] sm:$0xff] %v2160_v50  ;;  %1342 = vmatpush3.msra.mxu1 %v417_v12  ;;  %v536_v2 = vand.u32 4294901760, %v535_v29  ;;  %v542_v61 = vsub.f32 %v2123_v60, %v2662_v37  ;;  %1315 = vmatprep.subr.mxu0 %v2114_v46  ;;  %v198_v37 = vld [vmem:[%s1849_s6] sm:$0xff]  ;;  %v2188_v24 = vand.u32 4294901760, %v2162_v44  ;;  %v2666_v20 = vand.u32 4294901760, %v2160_v50 }
  0x75   : > { %v424_v32 = vand.u32 4294901760, %v423_v43  ;;  %v430_v12 = vsub.f32 %v2134_v27, %v2663_v13  ;;  %1316 = vmatpush3.msra.mxu0 %v2126_v14  ;;  %v549_v43 = vsub.f32 %v2148_v1, %v2664_v30  ;;  %v2192_v13 = vsub.f32 %v2048_v38, %v2076_v62 }
  0x76   : > { %1343 = vmatprep.subr.mxu1 %v536_v2  ;;  %v543_v28 = vand.u32 4294901760, %v542_v61  ;;  %1317 = vmatprep.subr.mxu0 %v2137_v26  ;;  %v437_v2 = vsub.f32 %v2160_v50, %v2666_v20  ;;  %v2605_v61 = vand.u32 4294901760, %v2180_v21  ;;  %v2199_v7 = vand.u32 4294901760, %v199_v36 }
  0x77   : > { %2665 = vst [vmem:[#allocation34_spill] sm:$0xff] %v2192_v13  ;;  %1344 = vmatpush3.msra.mxu1 %v424_v32  ;;  %v431_v29 = vand.u32 4294901760, %v430_v12  ;;  %v550_v30 = vand.u32 4294901760, %v549_v43  ;;  %1318 = vmatpush3.msra.mxu0 %v2156_v41  ;;  %v2606_v1 = vand.u32 4294901760, %v2192_v13  ;;  %v2205_v32 = vsub.f32 %v2058_v47, %v2090_v19 }
  0x78   : > { %2667 = vst [vmem:[#allocation35_spill] sm:$0xff] %v2199_v7  ;;  %1345 = vmatprep.subr.mxu1 %v543_v28  ;;  %v2207_v38 = vand.u32 4294901760, %v198_v37  ;;  %v438_v12 = vand.u32 4294901760, %v437_v2  ;;  %1319 = vmatprep.subr.mxu0 %v2170_v52  ;;  %v556_v20 = vsub.f32 %v2180_v21, %v2605_v61  ;;  %v2214_v28 = vsub.f32 %v199_v36, %v2199_v7 }
  0x79   : > { %1346 = vmatpush3.msra.mxu1 %v431_v29  ;;  %v2218_v43 = vsub.f32 %v2069_v49, %v2101_v33  ;;  %1320 = vmatpush3.msra.mxu0 %v2188_v24  ;;  %v444_v47 = vsub.f32 %v2192_v13, %v2606_v1  ;;  %v2230_v36 = vsub.f32 %v2082_v39, %v2114_v46 }
  0x7a   : > { %2668 = vst [vmem:[#allocation36_spill] sm:$0xff] %v2207_v38  ;;  %1347 = vmatprep.subr.mxu1 %v550_v30  ;;  %v2226_v2 = vsub.f32 %v198_v37, %v2207_v38  ;;  %v557_v61 = vand.u32 4294901760, %v556_v20  ;;  %v2611_v49 = vand.u32 4294901760, %v2214_v28  ;;  %1365 = vmatprep.subr.mxu0 %v1879_v18  ;;  %v2237_v1 = vsub.f32 %v2092_v34, %v2126_v14 }
  0x7b   : > { %2669 = vst [vmem:[#allocation37_spill] sm:$0xff] %v2218_v43  ;;  %1348 = vmatpush3.msra.mxu1 %v438_v12  ;;  %v2614_v30 = vand.u32 4294901760, %v2218_v43  ;;  %v445_v29 = vand.u32 4294901760, %v444_v47  ;;  %v2670_v37 = vand.u32 4294901760, %v2205_v32  ;;  %588 = vmatprep.mubr.f32.mxu1 %v2199_v7  ;;  %v2672_v7 = vand.u32 4294901760, %v2230_v36 }
  0x7c   : > { %1349 = vmatprep.subr.mxu1 %v557_v61  ;;  %v335_v20 = vsub.f32 %v2214_v28, %v2611_v49  ;;  %v2671_v12 = vand.u32 4294901760, %v2226_v2  ;;  %v2264_v14 = vsub.f32 %v2128_v51, %v2156_v41  ;;  %v2673_v46 = vand.u32 4294901760, %v2237_v1 }
  0x7d   : > { %v563_v33 = vsub.f32 %v2205_v32, %v2670_v37  ;;  %v451_v34 = vsub.f32 %v2218_v43, %v2614_v30  ;;  %v2254_v37 = vsub.f32 %v2103_v53, %v2137_v26  ;;  %1350 = vmatpush3.msra.mxu1 %v445_v29  ;;  %v570_v49 = vsub.f32 %v2230_v36, %v2672_v7 }
  0x7e   : > { %v341_v61 = vsub.f32 %v2226_v2, %v2671_v12  ;;  %v336_v30 = vand.u32 4294901760, %v335_v20  ;;  %v458_v53 = vsub.f32 %v2237_v1, %v2673_v46  ;;  %v2621_v12 = vand.u32 4294901760, %v2264_v14 }
  0x7f   : > { %v564_v39 = vand.u32 4294901760, %v563_v33  ;;  %v452_v47 = vand.u32 4294901760, %v451_v34  ;;  %v2622_v33 = vand.u32 4294901760, %v2254_v37  ;;  %v571_v26 = vand.u32 4294901760, %v570_v49 }
  0x80   : > { %v342_v29 = vand.u32 4294901760, %v341_v61  ;;  %v2273_v7 = vsub.f32 %v2139_v56, %v2170_v52  ;;  %337 = vmatprep.mubr.f32.mxu0 %v336_v30  ;;  %v459_v51 = vand.u32 4294901760, %v458_v53  ;;  %v2280_v46 = vsub.f32 %v2162_v44, %v2188_v24  ;;  %v201_v61 = vld [vmem:[%s1849_s6 + $0x18] sm:$0xff] }
  0x81   : > { %1351 = vmatprep.subr.mxu1 %v564_v39  ;;  %v577_v20 = vsub.f32 %v2254_v37, %v2622_v33  ;;  %v465_v49 = vsub.f32 %v2264_v14, %v2621_v12  ;;  %v2680_v12 = vld [vmem:[#allocation17_spill] sm:$0xff] }
  0x82   : > { %1352 = vmatpush3.msra.mxu1 %v452_v47  ;;  %2674 = vst [vmem:[#allocation38_spill] sm:$0xff] %v2280_v46  ;;  %343 = vmatmul.mubr.f32.vlgmr.msra.gmra.mxu0 %v342_v29  ;;  %v2620_v56 = vand.u32 4294901760, %v2273_v7  ;;  %v2619_v39 = vand.u32 4294901760, %v2280_v46  ;;  %v200_v29 = vld [vmem:[%s1849_s6 + $0x10] sm:$0xff] }
  0x83   : > { %1353 = vmatprep.subr.mxu1 %v571_v26  ;;  %1366 = vmatpush3.msra.mxu0 %v1892_v23  ;;  %v578_v30 = vand.u32 4294901760, %v577_v20  ;;  %v466_v44 = vand.u32 4294901760, %v465_v49  ;;  %v2308_v20 = vand.u32 4294901760, %v200_v29 }
  0x84   : > { %1354 = vmatpush3.msra.mxu1 %v459_v51  ;;  %1367 = vmatprep.subr.mxu0 %v1898_v25  ;;  %v584_v26 = vsub.f32 %v2273_v7, %v2620_v56  ;;  %v472_v34 = vsub.f32 %v2280_v46, %v2619_v39  ;;  %v2302_v51 = vand.u32 4294901760, %v201_v61  ;;  %v2679_v56 = vld [vmem:[#allocation16_spill] sm:$0xff] }
  0x85   : > { %1368 = vmatpush3.msra.mxu0 %v1912_v31  ;;  %1355 = vmatprep.subr.mxu1 %v578_v30  ;;  %v2322_v30 = vsub.f32 %v200_v29, %v2308_v20  ;;  %v2678_v29 = vld [vmem:[#allocation15_spill] sm:$0xff] }
  0x86   : > { %1369 = vmatprep.subr.mxu0 %v1921_v35  ;;  %1356 = vmatpush3.msra.mxu1 %v466_v44  ;;  %v585_v47 = vand.u32 4294901760, %v584_v26  ;;  %v473_v53 = vand.u32 4294901760, %v472_v34  ;;  %v2315_v49 = vsub.f32 %v201_v61, %v2302_v51  ;;  %v2675_v34 = vld [vmem:[#allocation13_spill] sm:$0xff]  ;;  %v2676_v61 = vld [vmem:[#allocation14_spill] sm:$0xff] }
  0x87   : > { %1370 = vmatpush3.msra.mxu0 %v1934_v40  ;;  %v2627_v26 = vand.u32 4294901760, %v2322_v30 }
  0x88   : > { %1357 = vmatprep.subr.mxu1 %v585_v47  ;;  %1371 = vmatprep.subr.mxu0 %v1948_v45  ;;  %v2623_v44 = vand.u32 4294901760, %v2315_v49 }
  0x89   : > { %1358 = vmatpush3.msra.mxu1 %v473_v53  ;;  %1372 = vmatpush3.msra.mxu0 %v1974_v59  ;;  %v2677_v53 = vld [vmem:[#allocation32_spill] sm:$0xff]  ;;  %v356_v39 = vsub.f32 %v2322_v30, %v2627_v26  ;;  %v2684_v26 = vld [vmem:[#allocation21_spill] sm:$0xff] }
  0x8a   : > { %590 = vmatmul.mubr.f32.vlgmr.msra.gmra.mxu1 %v2207_v38  ;;  %1373 = vmatprep.subr.mxu0 %v1986_v0  ;;  %v350_v47 = vsub.f32 %v2315_v49, %v2623_v44  ;;  %v2681_v44 = vld [vmem:[#allocation18_spill] sm:$0xff]  ;;  %v2682_v38 = vld [vmem:[#allocation19_spill] sm:$0xff] }
  0x8b   : > { %1403 = vmatprep.subr.mxu1 %v1859_v3  ;;  %1374 = vmatpush3.msra.mxu0 %v1997_v8 }
  0x8c   : > { %1404 = vmatpush3.msra.mxu1 %v1861_v4  ;;  %1375 = vmatprep.subr.mxu0 %v2008_v42  ;;  %v351_v33 = vand.u32 4294901760, %v350_v47  ;;  %v2686_v47 = vld [vmem:[#allocation23_spill] sm:$0xff] }
  0x8d   : > { %1405 = vmatprep.subr.mxu1 %v1863_v5  ;;  %1376 = vmatpush3.msra.mxu0 %v2020_v48 }
  0x8e   : > { %1406 = vmatpush3.msra.mxu1 %v1865_v9  ;;  %1377 = vmatprep.subr.mxu0 %v2034_v57 }
  0x8f   : > { %1407 = vmatprep.subr.mxu1 %v1867_v10  ;;  %1378 = vmatpush3.msra.mxu0 %v2046_v6 }
  0x90   : > { %1408 = vmatpush3.msra.mxu1 %v1869_v11  ;;  %1379 = vmatprep.subr.mxu0 %v2067_v54 }
  0x91   : > { %1409 = vmatprep.subr.mxu1 %v1872_v15  ;;  %1380 = vmatpush3.msra.mxu0 %v2080_v63 }
  0x92   : > { %1410 = vmatpush3.msra.mxu1 %v1874_v16  ;;  %1381 = vmatprep.subr.mxu0 %v2098_v55 }
  0x93   : > { %1411 = vmatprep.subr.mxu1 %v1876_v17  ;;  %1382 = vmatpush3.msra.mxu0 %v2111_v58 }
  0x94   : > { %1412 = vmatpush3.msra.mxu1 %v1889_v22  ;;  %1383 = vmatprep.subr.mxu0 %v2123_v60 }
  0x95   : > { %1413 = vmatprep.subr.mxu1 %v2675_v34  ;;  %1384 = vmatpush3.msra.mxu0 %v2134_v27 }
  0x96   : > { %1414 = vmatpush3.msra.mxu1 %v2676_v61  ;;  %1385 = vmatprep.subr.mxu0 %v2677_v53 }
  0x97   : > { %1415 = vmatprep.subr.mxu1 %v2678_v29  ;;  %1386 = vmatpush3.msra.mxu0 %v2160_v50  ;;  %v357_v50 = vand.u32 4294901760, %v356_v39  ;;  %v2683_v29 = vld [vmem:[#allocation20_spill] sm:$0xff]  ;;  %v2688_v39 = vld [vmem:[#allocation25_spill] sm:$0xff] }
  0x98   : > { %1416 = vmatpush3.msra.mxu1 %v2679_v56  ;;  %1387 = vmatprep.subr.mxu0 %v2180_v21 }
  0x99   : > { %1417 = vmatprep.subr.mxu1 %v2680_v12  ;;  %1388 = vmatpush3.msra.mxu0 %v2192_v13  ;;  %v2685_v13 = vld [vmem:[#allocation22_spill] sm:$0xff] }
  0x9a   : > { %1418 = vmatpush3.msra.mxu1 %v2681_v44  ;;  %1389 = vmatprep.subr.mxu0 %v2205_v32 }
  0x9b   : > { %1419 = vmatprep.subr.mxu1 %v2682_v38  ;;  %1390 = vmatpush3.msra.mxu0 %v2218_v43  ;;  %v2687_v43 = vld [vmem:[#allocation24_spill] sm:$0xff] }
  0x9c   : > { %1420 = vmatpush3.msra.mxu1 %v2683_v29  ;;  %1391 = vmatprep.subr.mxu0 %v2230_v36 }
  0x9d   : > { %1421 = vmatprep.subr.mxu1 %v2684_v26  ;;  %352 = vmatprep.mubr.f32.mxu0 %v351_v33  ;;  %v2690_v33 = vld [vmem:[#allocation28_spill] sm:$0xff] }
  0x9e   : > { %1392 = vmatpush3.msra.mxu0 %v2237_v1  ;;  %1422 = vmatpush3.msra.mxu1 %v2685_v13 }
  0x9f   : > { %358 = vmatmul.mubr.f32.gmra.mxu0 %v357_v50  ;;  %1393 = vmatprep.subr.mxu0 %v2254_v37  ;;  %v2689_v50 = vand.u32 4294901760, %v1879_v18  ;;  %v2696_v18 = vld [vmem:[#allocation31_spill] sm:$0xff] }
  0xa0   : > { %1423 = vmatprep.subr.mxu1 %v2686_v47  ;;  %1394 = vmatpush3.msra.mxu0 %v2264_v14 }
  0xa1   : > { %1424 = vmatpush3.msra.mxu1 %v2687_v43  ;;  %1395 = vmatprep.subr.mxu0 %v2273_v7  ;;  %v2691_v43 = vand.u32 4294901760, %v1892_v23  ;;  %v2697_v23 = vand.u32 4294901760, %v1921_v35  ;;  %v2701_v35 = vand.u32 4294901760, %v1974_v59  ;;  %v2706_v59 = vand.u32 4294901760, %v2315_v49 }
  0xa2   : > { %1425 = vmatprep.subr.mxu1 %v2688_v39  ;;  %1396 = vmatpush3.msra.mxu0 %v2280_v46  ;;  %v2692_v39 = vld [vmem:[#allocation29_spill] sm:$0xff]  ;;  %v2693_v46 = vand.u32 4294901760, %v1898_v25  ;;  %v2698_v25 = vand.u32 4294901760, %v1934_v40  ;;  %v2704_v40 = vand.u32 4294901760, %v1997_v8  ;;  %v2713_v8 = vand.u32 4294901760, %v2098_v55 }
  0xa3   : > { %732 = vmatprep.mubr.f32.mxu0 %v2214_v28  ;;  %1426 = vmatpush3.msra.mxu1 %v2076_v62  ;;  %v2694_v62 = vand.u32 4294901760, %v1912_v31  ;;  %v2699_v31 = vand.u32 4294901760, %v1948_v45  ;;  %v2705_v45 = vand.u32 4294901760, %v2008_v42  ;;  %v2718_v42 = vld [vmem:[#allocation15_spill] sm:$0xff]  ;;  %v2729_v55 = vand.u32 4294901760, %v2254_v37  ;;  %v2738_v37 = vld [vmem:[#allocation36_spill] sm:$0xff] }
  0xa4   : > { %735 = vmatmul.mubr.f32.vlgmr.msra.gmra.mxu0 %v2226_v2  ;;  %1427 = vmatprep.subr.mxu1 %v2090_v19  ;;  %v2695_v19 = vld [vmem:[#allocation30_spill] sm:$0xff] }
  0xa5   : > { %1441 = vmatprep.subr.mxu0 %v2689_v50  ;;  %1428 = vmatpush3.msra.mxu1 %v2690_v33 }
  0xa6   : > { %1442 = vmatpush3.msra.mxu0 %v2691_v43  ;;  %595 = vmatprep.mubr.f32.mxu1 %v2302_v51  ;;  %v2702_v43 = vand.u32 4294901760, %v2226_v2  ;;  %v2733_v2 = vld [vmem:[#allocation25_spill] sm:$0xff] }
  0xa7   : > { %1429 = vmatprep.subr.mxu1 %v2692_v39  ;;  %1443 = vmatprep.subr.mxu0 %v2693_v46  ;;  %v2703_v46 = vand.u32 4294901760, %v1986_v0  ;;  %v2709_v0 = vand.u32 4294901760, %v2034_v57  ;;  %v2724_v57 = vand.u32 4294901760, %v2205_v32  ;;  %v2731_v32 = vld [vmem:[#allocation24_spill] sm:$0xff] }
  0xa8   : > { %597 = vmatmul.mubr.f32.gmra.mxu1 %v2308_v20  ;;  %1444 = vmatpush3.msra.mxu0 %v2694_v62  ;;  %v2700_v62 = vand.u32 4294901760, %v2214_v28  ;;  %v2707_v28 = vand.u32 4294901760, %v2020_v48 }
  0xa9   : > { %1430 = vmatpush3.msra.mxu1 %v2695_v19  ;;  %741 = vmatprep.mubr.f32.mxu0 %v2315_v49 }
  0xaa   : > { %1431 = vmatprep.subr.mxu1 %v2696_v18  ;;  %1445 = vmatprep.subr.mxu0 %v2697_v23 }
  0xab   : > { %744 = vmatmul.mubr.f32.gmra.mxu0 %v2322_v30  ;;  %1432 = vmatpush3.msra.mxu1 %v2156_v41 }
  0xac   : > { %1446 = vmatpush3.msra.mxu0 %v2698_v25  ;;  %1433 = vmatprep.subr.mxu1 %v2170_v52 }
  0xad   : > { %1447 = vmatprep.subr.mxu0 %v2699_v31  ;;  %1434 = vmatpush3.msra.mxu1 %v2188_v24 }
  0xae   : > { %848 = vmatprep.mubr.f32.mxu1 %v2700_v62  ;;  %1448 = vmatpush3.msra.mxu0 %v2701_v35 }
  0xaf   : > { %852 = vmatmul.mubr.f32.vlgmr.msra.gmra.mxu1 %v2702_v43  ;;  %1449 = vmatprep.subr.mxu0 %v2703_v46 }
  0xb0   : > { %1479 = vmatprep.subr.mxu1 %v1859_v3  ;;  %1450 = vmatpush3.msra.mxu0 %v2704_v40  ;;  %v2708_v3 = vand.u32 4294901760, %v2322_v30 }
  0xb1   : > { %1480 = vmatpush3.msra.mxu1 %v1861_v4  ;;  %1451 = vmatprep.subr.mxu0 %v2705_v45  ;;  %v2710_v4 = vand.u32 4294901760, %v2046_v6 }
  0xb2   : > { %1481 = vmatprep.subr.mxu1 %v1863_v5  ;;  %859 = vmatprep.mubr.f32.mxu1 %v2706_v59  ;;  %v2711_v5 = vand.u32 4294901760, %v2067_v54 }
  0xb3   : > { %1452 = vmatpush3.msra.mxu0 %v2707_v28  ;;  %1482 = vmatpush3.msra.mxu1 %v1865_v9  ;;  %v2712_v9 = vand.u32 4294901760, %v2080_v63  ;;  %v2725_v63 = vld [vmem:[#allocation37_spill] sm:$0xff] }
  0xb4   : > { %863 = vmatmul.mubr.f32.gmra.mxu1 %v2708_v3  ;;  %1453 = vmatprep.subr.mxu0 %v2709_v0  ;;  %v2726_v6 = vand.u32 4294901760, %v2725_v63 }
  0xb5   : > { %1483 = vmatprep.subr.mxu1 %v1867_v10  ;;  %1454 = vmatpush3.msra.mxu0 %v2710_v4  ;;  %v2714_v10 = vand.u32 4294901760, %v2111_v58  ;;  %v2730_v58 = vand.u32 4294901760, %v2264_v14 }
  0xb6   : > { %1484 = vmatpush3.msra.mxu1 %v1869_v11  ;;  %1455 = vmatprep.subr.mxu0 %v2711_v5  ;;  %v2715_v11 = vand.u32 4294901760, %v2123_v60  ;;  %v2722_v60 = vld [vmem:[#allocation34_spill] sm:$0xff] }
  0xb7   : > { %1485 = vmatprep.subr.mxu1 %v1872_v15  ;;  %1456 = vmatpush3.msra.mxu0 %v2712_v9  ;;  %v2716_v15 = vand.u32 4294901760, %v2134_v27  ;;  %v2723_v54 = vand.u32 4294901760, %v2722_v60  ;;  %v2728_v27 = vand.u32 4294901760, %v2237_v1 }
  0xb8   : > { %1486 = vmatpush3.msra.mxu1 %v1874_v16  ;;  %1457 = vmatprep.subr.mxu0 %v2713_v8  ;;  %v2717_v16 = vand.u32 4294901760, %v2677_v53 }
  0xb9   : > { %1487 = vmatprep.subr.mxu1 %v1876_v17  ;;  %1458 = vmatpush3.msra.mxu0 %v2714_v10  ;;  %v2719_v17 = vld [vmem:[#allocation33_spill] sm:$0xff] }
  0xba   : > { %1488 = vmatpush3.msra.mxu1 %v1889_v22  ;;  %1459 = vmatprep.subr.mxu0 %v2715_v11  ;;  %v2720_v48 = vand.u32 4294901760, %v2719_v17  ;;  %v2721_v22 = vand.u32 4294901760, %v2180_v21  ;;  %v2727_v21 = vand.u32 4294901760, %v2230_v36  ;;  %v2734_v36 = vld [vmem:[#allocation38_spill] sm:$0xff] }
  0xbb   : > { %1489 = vmatprep.subr.mxu1 %v2675_v34  ;;  %1460 = vmatpush3.msra.mxu0 %v2716_v15  ;;  %v2735_v1 = vand.u32 4294901760, %v2734_v36 }
  0xbc   : > { %1490 = vmatpush3.msra.mxu1 %v2676_v61  ;;  %1461 = vmatprep.subr.mxu0 %v2717_v16 }
  0xbd   : > { %1491 = vmatprep.subr.mxu1 %v2718_v42  ;;  %1462 = vmatpush3.msra.mxu0 %v2720_v48 }
  0xbe   : > { %1492 = vmatpush3.msra.mxu1 %v2679_v56  ;;  %1463 = vmatprep.subr.mxu0 %v2721_v22  ;;  %v2739_v56 = vld [vmem:[#allocation27_spill] sm:$0xff] }
  0xbf   : > { %1493 = vmatprep.subr.mxu1 %v2680_v12  ;;  %1464 = vmatpush3.msra.mxu0 %v2723_v54  ;;  %v2736_v12 = vld [vmem:[#allocation35_spill] sm:$0xff] }
  0xc0   : > { %1494 = vmatpush3.msra.mxu1 %v2681_v44  ;;  %1465 = vmatprep.subr.mxu0 %v2724_v57 }
  0xc1   : > { %1495 = vmatprep.subr.mxu1 %v2682_v38  ;;  %1466 = vmatpush3.msra.mxu0 %v2726_v6  ;;  %v2732_v38 = vand.u32 4294901760, %v2273_v7 }
  0xc2   : > { %1496 = vmatpush3.msra.mxu1 %v2683_v29  ;;  %1467 = vmatprep.subr.mxu0 %v2727_v21  ;;  %v235_v29 = vstv %s234_s24 }
  0xc3   : > { %1497 = vmatprep.subr.mxu1 %v2684_v26  ;;  %1468 = vmatpush3.msra.mxu0 %v2728_v27 }
  0xc4   : > { %1498 = vmatpush3.msra.mxu1 %v2685_v13  ;;  %1469 = vmatprep.subr.mxu0 %v2729_v55  ;;  %v2737_v13 = vld [vmem:[#allocation26_spill] sm:$0xff] }
  0xc5   : > { %1499 = vmatprep.subr.mxu1 %v2686_v47  ;;  %1470 = vmatpush3.msra.mxu0 %v2730_v58 }
  0xc6   : > { %1500 = vmatpush3.msra.mxu1 %v2731_v32  ;;  %1471 = vmatprep.subr.mxu0 %v2732_v38 }
  0xc7   : > { %1501 = vmatprep.subr.mxu1 %v2733_v2  ;;  %1472 = vmatpush3.msra.mxu0 %v2735_v1 }
  0xc8   : > { %1029 = vmatprep.mubr.f32.mxu0 %v2736_v12  ;;  %1502 = vmatpush3.msra.mxu1 %v2737_v13 }
  0xc9   : > { %1031 = vmatmul.mubr.f32.vlgmr.msra.gmra.mxu0 %v2738_v37  ;;  %1503 = vmatprep.subr.mxu1 %v2739_v56 }
  0xca   : > { %1504 = vmatpush3.msra.mxu1 %v2690_v33  ;;  %1036 = vmatprep.mubr.f32.mxu0 %v2302_v51 }
  0xcb   : > { %1505 = vmatprep.subr.mxu1 %v2692_v39  ;;  %1140 = vmatprep.mubr.f32.mxu1 %v2736_v12 }
  0xcc   : > { %1506 = vmatpush3.msra.mxu1 %v2695_v19 }
  0xcd   : > { %1038 = vmatmul.mubr.f32.gmra.mxu0 %v2308_v20  ;;  %1507 = vmatprep.subr.mxu1 %v2696_v18 }
  0xce   : > { %1508 = vmatpush3.msra.mxu1 %v2156_v41 }
  0xcf   : > { %1509 = vmatprep.subr.mxu1 %v2170_v52 }
  0xd0   : > { %1510 = vmatpush3.msra.mxu1 %v2188_v24 }
  0xd1   : > { %1142 = vmatmul.mubr.f32.vlgmr.msra.gmra.mxu1 %v2738_v37 }
  0xd2   : > { %1147 = vmatprep.mubr.f32.mxu1 %v2302_v51 }
  0xd5   : > { %1149 = vmatmul.mubr.f32.gmra.mxu1 %v2308_v20 }
 0x142   : > { %v1321_v14 = vpop.f32.mrf.mxu0 }
 0x144   : > { %v1322_v7 = vpop.f32.mrf.mxu0 }
 0x145   : > { %v1323_v24 = vadd.f32 %v1322_v7, %v1321_v14 }
 0x147   : > { %v345_v20 = vadd.f32 %v1323_v24, %v235_v29 }
 0x14a   : > { %v1359_v19 = vpop.f32.mrf.mxu1 }
 0x14c   : > { %v1360_v44 = vpop.f32.mrf.mxu1 }
 0x14d   : > { %v1361_v33 = vadd.f32 %v1360_v44, %v1359_v19 }
 0x14f   : > { %v592_v43 = vadd.f32 %v1361_v33, %v345_v20 }
 0x15f   : > { %v1324_v49 = vpop.f32.mrf.mxu0 }
 0x161   : > { %v1325_v30 = vpop.f32.mrf.mxu0 }
 0x162   : > { %v1326_v51 = vadd.f32 %v1325_v30, %v1324_v49 }
 0x164   : > { %v1397_v26 = vpop.f32.mrf.mxu0  ;;  %v360_v25 = vadd.f32 %v1326_v51, %v235_v29 }
 0x166   : > { %v1398_v41 = vpop.f32.mrf.mxu0 }
 0x167   : > { %v1399_v31 = vadd.f32 %v1398_v41, %v1397_v26 }
 0x168   : > { %v1362_v34 = vpop.f32.mrf.mxu1 }
 0x169   : > { %v737_v45 = vadd.f32 %v1399_v31, %v592_v43 }
 0x16a   : > { %v1363_v61 = vpop.f32.mrf.mxu1 }
 0x16b   : > { %v1400_v52 = vpop.f32.mrf.mxu0  ;;  %v1364_v62 = vadd.f32 %v1363_v61, %v1362_v34 }
 0x16d   : > { %v1401_v47 = vpop.f32.mrf.mxu0  ;;  %v599_v59 = vadd.f32 %v1364_v62, %v360_v25 }
 0x16e   : > { %v1402_v28 = vadd.f32 %v1401_v47, %v1400_v52 }
 0x16f   : > { %v1435_v53 = vpop.f32.mrf.mxu1 }
 0x170   : > { %v746_v10 = vadd.f32 %v1402_v28, %v599_v59 }
 0x171   : > { %v1436_v39 = vpop.f32.mrf.mxu1 }
 0x172   : > { %v1437_v46 = vadd.f32 %v1436_v39, %v1435_v53 }
 0x174   : > { %v1438_v18 = vpop.f32.mrf.mxu1  ;;  %v854_v5 = vadd.f32 %v1437_v46, %v737_v45 }
 0x176   : > { %v1439_v40 = vpop.f32.mrf.mxu1 }
 0x177   : > { %v1440_v9 = vadd.f32 %v1439_v40, %v1438_v18 }
 0x179   : > { %v865_v17 = vadd.f32 %v1440_v9, %v746_v10 }
 0x189   : > { %v1473_v50 = vpop.f32.mrf.mxu0 }
 0x18b   : > { %v1474_v23 = vpop.f32.mrf.mxu0 }
 0x18c   : > { %v1475_v3 = vadd.f32 %v1474_v23, %v1473_v50 }
 0x18d   : > { %v1476_v35 = vpop.f32.mrf.mxu0 }
 0x18e   : > { %v1033_v11 = vadd.f32 %v1475_v3, %v854_v5 }
 0x18f   : > { %v1477_v0 = vpop.f32.mrf.mxu0 }
 0x190   : > { %v1478_v15 = vadd.f32 %v1477_v0, %v1476_v35 }
 0x191   : > { %v1511_v4 = vpop.f32.mrf.mxu1 }
 0x192   : > { %v1040_v60 = vadd.f32 %v1478_v15, %v865_v17 }
 0x193   : > { %v1512_v8 = vpop.f32.mrf.mxu1 }
 0x194   : > { %v1513_v16 = vadd.f32 %v1512_v8, %v1511_v4 }
 0x195   : > { %v1514_v42 = vpop.f32.mrf.mxu1 }
 0x196   : > { %v1144_v48 = vadd.f32 %v1513_v16, %v1033_v11 }
 0x197   : > { %v1515_v22 = vpop.f32.mrf.mxu1 }
 0x198   : > { %1154 = vst [vmem:[%s186_s12] sm:$0xff] %v1144_v48  ;;  %v1516_v54 = vadd.f32 %v1515_v22, %v1514_v42  ;;  %1163 = sbr.rel (!%p2740_p4) target bundleno = 440 (0x1b8), region = 40 }
 0x19a   : > { %v1151_v57 = vadd.f32 %v1516_v54, %v1040_v60 }
 0x19c   : > { %1155 = vst [vmem:[%s186_s12 + $0x8] sm:$0xff] %v1151_v57 }
 0x19d   : > { %s2749_s30 = smov (!%p1166_p13, %s1165_s30), 2 }
 0x19e   : > { %s2500_s7 = sshll.u32 %s2749_s30, 7 }
 0x19f   : > { %s1170_s8 = ssub.s32 256, %s2500_s7 }
 0x1a0   : > { %1171 = vsyncadd %s1157_s18, %s1170_s8  ;;  %p1279_p5 = scmp.ne.s32.totalorder %s2500_s7, 0  ;;  %s1288_s9 = sshll.u32 %s1748_s0, 8 }
 0x1a1   : > { %s2510_s11 = scalar_lea.hbm %s2559_s3, %s1288_s9  ;;  %s1176_s13 = sshll.u32 %s186_s12, 4  ;;  %s2512_s13 = int_to_ptr.vmem [resolvable:$true] %s1176_s13 }
 0x1a2   : > { %s1625_s20 = scalar_lea.vmem %s2512_s13, %s2500_s7  ;;  %s1701_s21 = smov [#allocation9]  }
 0x1a3   : > { %p1626_p0 = scmp.ne.s32.totalorder %s2512_s13, %s1625_s20  ;;  %s1629_s23 = sshll.u32 %s1701_s21, 4  ;;  %s1630_s23 = int_to_ptr.vmem [resolvable:$false] %s1629_s23 }
 0x1a4   : > { %s1631_s0 = scalar_lea.vmem %s1630_s23, 512  ;;  %p1632_p8 = scmp.lt.s32.totalorder %s2512_s13, %s1630_s23 }
 0x1a5   : > { %p1627_p7 = pnand %p1626_p0, %p1279_p5  ;;  %p1633_p9 = scmp.lt.s32.totalorder %s1631_s0, %s1625_s20 }
 0x1a7   : > { %p1628_p3 = pneg %p1627_p7  ;;  %p1634_p10 = por %p1633_p9, %p1632_p8 }
 0x1a9   : > { %p1635_p6 = pnand %p1634_p10, %p1628_p3 }
 0x1ab   : > { %1638 = shalt.err (!%p1635_p6)
}
 0x1ac   : > { %s1639_s4 = scalar_lea.hbm %s2510_s11, %s2500_s7  ;;  %s1643_s24 = scalar_lea.hbm %s2559_s3, 640 }
 0x1ad   : > { %p1640_p11 = scmp.ne.s32.totalorder %s2510_s11, %s1639_s4  ;;  %p1644_p1 = scmp.lt.s32.totalorder %s2510_s11, %s2559_s3 }
 0x1ae   : > { %p1645_p4 = scmp.lt.s32.totalorder %s1643_s24, %s1639_s4 }
 0x1af   : > { %p1641_p12 = pnand %p1640_p11, %p1279_p5 }
 0x1b0   : > { %p1646_p13 = por %p1645_p4, %p1644_p1 }
 0x1b1   : > { %p1642_p2 = pneg %p1641_p12 }
 0x1b3   : > { %p1647_p0 = pnand %p1646_p13, %p1642_p2 }
 0x1b5   : > { %1650 = shalt.err (!%p1647_p0)
}
 0x1b6   : > { %s1702_s29 = smov 128   ;;  %s1703_s30 = smov 8  }
 0x1b7   : > { %1182 = dma.vmem_to_hbm [thread:$0]  (%p1279_p5), %s2512_s13, %s2500_s7, %s2510_s11, %s1157_s18, %s1702_s29, %s1702_s29, %s1703_s30  }
 0x1b8 PF: > { %p1533_p7 = scmp.ge.s32.totalorder %s1693_s17, 2  ;;  %s1191_s8 = sand.u32 1, %s1681_s14  }
 0x1b9   : > { %p2741_p3 = scmp.ne.s32.totalorder %s2636_s26, 0  ;;  %s1192_s9 = scalar_lea.sflag [#allocation6], %s1191_s8 }
 0x1bb   : > { %p1528_p8 = pnand %p1533_p7, %p2741_p3 }
 0x1bd   : > { %p1529_p9 = pneg %p1528_p8 }
 0x1bf   : > { %1676 = dma.done.wait (%p1529_p9), %s1192_s9, 256  }
 0x1c0   : > { %1678 = vsyncadd (%p1529_p9), %s1192_s9, 4294967040  ;;  %p18_p10 = scmp.ge.s32.totalorder %s1752_s19, 5   ;;  %s2742_s14 = smov %s1685_s15 }
 0x1c1   : > { %s2743_s15 = smov %s1689_s16  ;;  %s2744_s16 = smov %s1764_s22 }
 0x1c2   : > { %s2745_s17 = smov %s1752_s19  ;;  %20 = sbr.rel (!%p18_p10) target bundleno = 8 (0x8), region = 77 }
 0x1c7   :  { %1197 = vsyncpa [#allocation5], 1 }
 0x1c8   :  { %1199 = vsyncpa [#allocation5 + $0x1], 1 }
 0x1c9   :  { %1200 = vsyncpa [#allocation8], 1 }
 0x1ca   :  { %1201 = vsyncpa [#allocation6], 1 }
 0x1cb   :  { %1203 = vsyncpa [#allocation6 + $0x1], 1 }

</bundles_post_ra>
